<compile_context>
chip_gen: v7x
topology: tpu7x:2x2x1
jax: 0.10.0
libtpu: 0.0.40
codegen_flags: <defaults>
</compile_context>

<pallas_src>
import functools

import jax
import jax.numpy as jnp
from jax.experimental import pallas as pl
from jax.experimental.pallas import tpu as pltpu

LANE = 128      # vreg lane width
SUBLANE = 8     # f32 sublane count


def _round_up(x, m):
    return (x + m - 1) // m * m


def actor_critic_kernel(x_ref, w1_ref, b1_ref, w2_ref, b2_ref, w3_ref, b3_ref, o_ref):
    """One batch tile: 3 matmuls + bias adds + ReLUs, fully fused in VMEM.

    Matmul operands are cast to the weight dtype (no-op for f32, bf16 MXU path if
    the wrapper stores bf16 weights); accumulation is always f32. Bias adds and
    ReLUs stay in f32 (native VPU on all generations, incl. v5e).
    """
    x = x_ref[...]

    h1 = jnp.dot(x.astype(w1_ref.dtype), w1_ref[...],
                 preferred_element_type=jnp.float32) + b1_ref[...]
    h1 = jnp.maximum(h1, 0.0)

    h2 = jnp.dot(h1.astype(w2_ref.dtype), w2_ref[...],
                 preferred_element_type=jnp.float32) + b2_ref[...]
    h2 = jnp.maximum(h2, 0.0)

    out = jnp.dot(h2.astype(w3_ref.dtype), w3_ref[...],
                  preferred_element_type=jnp.float32) + b3_ref[...]
    o_ref[...] = out.astype(o_ref.dtype)


@functools.partial(jax.jit, static_argnames=("tm", "weights_dtype"))
def actor_critic_forward(observation, params, *, tm=512, weights_dtype=jnp.float32):
    """observation: [batch, input_dim] float32; params: dict of f32 weights/biases.

    Returns [batch, output_dim] float32, identical math to the PyTorch module.
    Set weights_dtype=jnp.bfloat16 on v6e/v7x for the bf16 MXU path (f32 accum).
    """
    w1, b1 = params["w1"], params["b1"]
    w2, b2 = params["w2"], params["b2"]
    w3, b3 = params["w3"], params["b3"]

    batch, in_dim = observation.shape
    hid1 = w1.shape[1]          # 128 (already lane-dense)
    hid2 = w2.shape[1]          # 64
    out_dim = w3.shape[1]

    # ---- lane-dense padding of hidden-2 and output widths (zero columns are
    #      numerically inert through ReLU and the final matmul) -------------
    hid2_p = _round_up(hid2, LANE)
    out_p = _round_up(out_dim, LANE)
    w2p = jnp.pad(w2, ((0, 0), (0, hid2_p - hid2)))
    b2p = jnp.pad(b2, ((0, 0), (0, hid2_p - hid2)))
    w3p = jnp.pad(w3, ((0, hid2_p - hid2), (0, out_p - out_dim)))
    b3p = jnp.pad(b3, ((0, 0), (0, out_p - out_dim)))

    # Optional bf16 weights for MXU; biases stay f32 (f32 VPU adds everywhere).
    w1c = w1.astype(weights_dtype)
    w2c = w2p.astype(weights_dtype)
    w3c = w3p.astype(weights_dtype)

    # ---- batch tiling: big sublane-aligned tiles, batch zero-padded --------
    tm_eff = _round_up(min(tm, _round_up(batch, SUBLANE)), SUBLANE)
    batch_p = _round_up(batch, tm_eff)
    xp = jnp.pad(observation, ((0, batch_p - batch), (0, 0)))
    grid = (batch_p // tm_eff,)

    def resident(shape):
        # Constant index_map -> same block every grid step -> fetched once,
        # stays VMEM-resident across the whole grid.
        return pl.BlockSpec(shape, lambda i: tuple(0 for _ in shape))

    flops = 2 * batch_p * (in_dim * hid1 + hid1 * hid2_p + hid2_p * out_p)
    bytes_accessed = (
        xp.size * xp.dtype.itemsize
        + batch_p * out_p * 4
        + sum(int(a.size) * a.dtype.itemsize
              for a in (w1c, b1, w2c, b2p, w3c, b3p))
    )

    out = pl.pallas_call(
        actor_critic_kernel,
        out_shape=jax.ShapeDtypeStruct((batch_p, out_p), jnp.float32),
        grid=grid,
        in_specs=[
            pl.BlockSpec((tm_eff, in_dim), lambda i: (i, 0)),   # x: tiled over batch
            resident(w1c.shape), resident(b1.shape),
            resident(w2c.shape), resident(b2p.shape),
            resident(w3c.shape), resident(b3p.shape),
        ],
        out_specs=pl.BlockSpec((tm_eff, out_p), lambda i: (i, 0)),
        compiler_params=pltpu.CompilerParams(
            dimension_semantics=("parallel",),   # v7x: shard batch tiles across 2 TCs
        ),
        cost_estimate=pl.CostEstimate(
            flops=flops, transcendentals=0, bytes_accessed=bytes_accessed),
    )(xp, w1c, b1, w2c, b2p, w3c, b3p)

    # Slice off batch padding and the zero-padded output lanes.
    return out[:batch, :out_dim]


def init_params(key, input_dim, output_dim):
    """PyTorch nn.Linear default init (U[-1/sqrt(fan_in), 1/sqrt(fan_in)]).
    Weights stored [in_features, out_features]; biases stored (1, out_features)."""
    ks = jax.random.split(key, 6)

    def linear(kw, kb, fan_in, fan_out):
        bound = 1.0 / jnp.sqrt(jnp.float32(fan_in))
        w = jax.random.uniform(kw, (fan_in, fan_out), jnp.float32, -bound, bound)
        b = jax.random.uniform(kb, (1, fan_out), jnp.float32, -bound, bound)
        return w, b

    w1, b1 = linear(ks[0], ks[1], input_dim, 128)
    w2, b2 = linear(ks[2], ks[3], 128, 64)
    w3, b3 = linear(ks[4], ks[5], 64, output_dim)
    return {"w1": w1, "b1": b1, "w2": w2, "b2": b2, "w3": w3, "b3": b3}


def _reference(observation, params):
    h1 = jnp.maximum(observation @ params["w1"] + params["b1"], 0.0)
    h2 = jnp.maximum(h1 @ params["w2"] + params["b2"], 0.0)
    return h2 @ params["w3"] + params["b3"]


if __name__ == "__main__":
    # TODO(synk): torch.tensor(...) conversion and warnings.filterwarnings in the
    # original forward are host-side Python; no kernel equivalent.
    key = jax.random.PRNGKey(0)
    k_obs, k_obs2, k_params = jax.random.split(key, 3)

    input_dim, output_dim = 16, 4
    params = init_params(k_params, input_dim, output_dim)

    # Small batch (single grid step).
    obs_small = jax.random.normal(k_obs, (8, input_dim), dtype=jnp.float32)
    out_small = jax.block_until_ready(actor_critic_forward(obs_small, params))
    ref_small = _reference(obs_small, params)
    assert out_small.shape == (8, output_dim)
    assert jnp.allclose(out_small, ref_small, atol=1e-4, rtol=1e-4)

    # Larger, non-multiple batch: exercises tiling (tm=512) + batch padding path.
    obs_big = jax.random.normal(k_obs2, (1037, input_dim), dtype=jnp.float32)
    out_big = jax.block_until_ready(actor_critic_forward(obs_big, params))
    ref_big = _reference(obs_big, params)
    assert out_big.shape == (1037, output_dim)
    assert jnp.allclose(out_big, ref_big, atol=1e-4, rtol=1e-4)

    # bf16-weight MXU path (v6e/v7x fast path) — smoke test that it compiles/runs.
    out_bf16 = jax.block_until_ready(
        actor_critic_forward(obs_big, params, weights_dtype=jnp.bfloat16))
    assert out_bf16.shape == (1037, output_dim)

    print("KERNEL_OK")
</pallas_src>

<mosaic_0001>
module attributes {stable_mosaic.version = 11 : i64} {
  func.func @actor_critic_kernel(%arg0: i32, %arg1: memref<8x16xf32, #tpu.memory_space<vmem>>, %arg2: memref<16x128xf32, #tpu.memory_space<vmem>>, %arg3: memref<1x128xf32, #tpu.memory_space<vmem>>, %arg4: memref<128x128xf32, #tpu.memory_space<vmem>>, %arg5: memref<1x128xf32, #tpu.memory_space<vmem>>, %arg6: memref<128x128xf32, #tpu.memory_space<vmem>>, %arg7: memref<1x128xf32, #tpu.memory_space<vmem>>, %arg8: memref<8x128xf32, #tpu.memory_space<vmem>>) attributes {dimension_semantics = [#tpu.dimension_semantics<parallel>], iteration_bounds = array<i64: 1>, scalar_prefetch = 0 : i64, scratch_operands = 0 : i64, tpu.core_type = #tpu.core_type<tc>, window_params = [{transform_indices = @transform_0, window_bounds = array<i64: 8, 16>}, {pipeline_mode = #tpu.pipeline_mode<synchronous>, transform_indices = @transform_1, window_bounds = array<i64: 16, 128>}, {pipeline_mode = #tpu.pipeline_mode<synchronous>, transform_indices = @transform_2, window_bounds = array<i64: 1, 128>}, {pipeline_mode = #tpu.pipeline_mode<synchronous>, transform_indices = @transform_3, window_bounds = array<i64: 128, 128>}, {pipeline_mode = #tpu.pipeline_mode<synchronous>, transform_indices = @transform_4, window_bounds = array<i64: 1, 128>}, {pipeline_mode = #tpu.pipeline_mode<synchronous>, transform_indices = @transform_5, window_bounds = array<i64: 128, 128>}, {pipeline_mode = #tpu.pipeline_mode<synchronous>, transform_indices = @transform_6, window_bounds = array<i64: 1, 128>}, {transform_indices = @transform_7, window_bounds = array<i64: 8, 128>}]} {
    %c0 = arith.constant 0 : index
    %c0_0 = arith.constant 0 : index
    %0 = vector.load %arg1[%c0, %c0_0] : memref<8x16xf32, #tpu.memory_space<vmem>>, vector<8x16xf32>
    %c0_1 = arith.constant 0 : index
    %c0_2 = arith.constant 0 : index
    %1 = vector.load %arg2[%c0_1, %c0_2] : memref<16x128xf32, #tpu.memory_space<vmem>>, vector<16x128xf32>
    %cst = arith.constant dense<0.000000e+00> : vector<8x128xf32>
    %2 = tpu.matmul %0, %1, %cst {dimension_numbers = #tpu.dot_dimension_numbers<[1], [0], [0], [1], [0, 0, 1, 1], [], []>} : vector<8x16xf32>, vector<16x128xf32>, vector<8x128xf32> -> vector<8x128xf32>
    %c0_3 = arith.constant 0 : index
    %c0_4 = arith.constant 0 : index
    %3 = vector.load %arg3[%c0_3, %c0_4] : memref<1x128xf32, #tpu.memory_space<vmem>>, vector<1x128xf32>
    %4 = vector.broadcast %3 : vector<1x128xf32> to vector<8x128xf32>
    %5 = arith.addf %2, %4 : vector<8x128xf32>
    %cst_5 = arith.constant 0.000000e+00 : f32
    %6 = vector.broadcast %cst_5 : f32 to vector<8x128xf32>
    %7 = arith.maximumf %5, %6 : vector<8x128xf32>
    %c0_6 = arith.constant 0 : index
    %c0_7 = arith.constant 0 : index
    %8 = vector.load %arg4[%c0_6, %c0_7] : memref<128x128xf32, #tpu.memory_space<vmem>>, vector<128x128xf32>
    %cst_8 = arith.constant dense<0.000000e+00> : vector<8x128xf32>
    %9 = tpu.matmul %7, %8, %cst_8 {dimension_numbers = #tpu.dot_dimension_numbers<[1], [0], [0], [1], [0, 0, 1, 1], [], []>} : vector<8x128xf32>, vector<128x128xf32>, vector<8x128xf32> -> vector<8x128xf32>
    %c0_9 = arith.constant 0 : index
    %c0_10 = arith.constant 0 : index
    %10 = vector.load %arg5[%c0_9, %c0_10] : memref<1x128xf32, #tpu.memory_space<vmem>>, vector<1x128xf32>
    %11 = vector.broadcast %10 : vector<1x128xf32> to vector<8x128xf32>
    %12 = arith.addf %9, %11 : vector<8x128xf32>
    %cst_11 = arith.constant 0.000000e+00 : f32
    %13 = vector.broadcast %cst_11 : f32 to vector<8x128xf32>
    %14 = arith.maximumf %12, %13 : vector<8x128xf32>
    %c0_12 = arith.constant 0 : index
    %c0_13 = arith.constant 0 : index
    %15 = vector.load %arg6[%c0_12, %c0_13] : memref<128x128xf32, #tpu.memory_space<vmem>>, vector<128x128xf32>
    %cst_14 = arith.constant dense<0.000000e+00> : vector<8x128xf32>
    %16 = tpu.matmul %14, %15, %cst_14 {dimension_numbers = #tpu.dot_dimension_numbers<[1], [0], [0], [1], [0, 0, 1, 1], [], []>} : vector<8x128xf32>, vector<128x128xf32>, vector<8x128xf32> -> vector<8x128xf32>
    %c0_15 = arith.constant 0 : index
    %c0_16 = arith.constant 0 : index
    %17 = vector.load %arg7[%c0_15, %c0_16] : memref<1x128xf32, #tpu.memory_space<vmem>>, vector<1x128xf32>
    %18 = vector.broadcast %17 : vector<1x128xf32> to vector<8x128xf32>
    %19 = arith.addf %16, %18 : vector<8x128xf32>
    %c0_17 = arith.constant 0 : index
    %c0_18 = arith.constant 0 : index
    %20 = vector.load %arg8[%c0_17, %c0_18] : memref<8x128xf32, #tpu.memory_space<vmem>>, vector<8x128xf32>
    tpu.vector_store %arg8[%c0_17, %c0_18], %19 {strides = array<i32>} : memref<8x128xf32, #tpu.memory_space<vmem>>, vector<8x128xf32>,
    return
  }
  func.func @transform_0(%arg0: i32) -> (i32, i32) {
    %c0_i32 = arith.constant 0 : i32
    %c0_i32_0 = arith.constant 0 : i32
    return %arg0, %c0_i32 : i32, i32
  }
  func.func @transform_1(%arg0: i32) -> (i32, i32) {
    %c0_i32 = arith.constant 0 : i32
    %c0_i32_0 = arith.constant 0 : i32
    %c0_i32_1 = arith.constant 0 : i32
    return %c0_i32, %c0_i32_0 : i32, i32
  }
  func.func @transform_2(%arg0: i32) -> (i32, i32) {
    %c0_i32 = arith.constant 0 : i32
    %c0_i32_0 = arith.constant 0 : i32
    %c0_i32_1 = arith.constant 0 : i32
    return %c0_i32, %c0_i32_0 : i32, i32
  }
  func.func @transform_3(%arg0: i32) -> (i32, i32) {
    %c0_i32 = arith.constant 0 : i32
    %c0_i32_0 = arith.constant 0 : i32
    %c0_i32_1 = arith.constant 0 : i32
    return %c0_i32, %c0_i32_0 : i32, i32
  }
  func.func @transform_4(%arg0: i32) -> (i32, i32) {
    %c0_i32 = arith.constant 0 : i32
    %c0_i32_0 = arith.constant 0 : i32
    %c0_i32_1 = arith.constant 0 : i32
    return %c0_i32, %c0_i32_0 : i32, i32
  }
  func.func @transform_5(%arg0: i32) -> (i32, i32) {
    %c0_i32 = arith.constant 0 : i32
    %c0_i32_0 = arith.constant 0 : i32
    %c0_i32_1 = arith.constant 0 : i32
    return %c0_i32, %c0_i32_0 : i32, i32
  }
  func.func @transform_6(%arg0: i32) -> (i32, i32) {
    %c0_i32 = arith.constant 0 : i32
    %c0_i32_0 = arith.constant 0 : i32
    %c0_i32_1 = arith.constant 0 : i32
    return %c0_i32, %c0_i32_0 : i32, i32
  }
  func.func @transform_7(%arg0: i32) -> (i32, i32) {
    %c0_i32 = arith.constant 0 : i32
    %c0_i32_0 = arith.constant 0 : i32
    return %arg0, %c0_i32 : i32, i32
  }
}

</mosaic_0001>

<bundles_post_ra>
// kernel: actor_critic_forward.1
= control target key start
LH: loop header
LB: loop body
LE: loop exit
PB: predicated region body
PF: predicated region fallthrough
CT: control target
= control target key end

     0   :  { %v475_v0 = vmov 0.0|0.0   ;;  %vm476_vm0 = vmmov 0   ;;  %v477_v3 = vmov 0.0   ;;  %vm36_vm1 = vcmask 130048   ;;  %s655_s1 = inlined_call_operand.vmem [shape: f32[16,128], index: 1, kind: input, shape index: {}]   ;;  %s656_s3 = inlined_call_operand.vmem [shape: f32[128,128], index: 3, kind: input, shape index: {}]   ;;  %s657_s0 = inlined_call_operand.vmem [shape: f32[8,16], index: 0, kind: input, shape index: {}]   ;;  %s658_s5 = inlined_call_operand.vmem [shape: f32[128,128], index: 5, kind: input, shape index: {}]   ;;  %s659_s2 = inlined_call_operand.vmem [shape: f32[1,128], index: 2, kind: input, shape index: {}]   ;;  %s660_s4 = inlined_call_operand.vmem [shape: f32[1,128], index: 4, kind: input, shape index: {}]   ;;  %s661_s6 = inlined_call_operand.vmem [shape: f32[1,128], index: 6, kind: input, shape index: {}]   ;;  %s662_s7 = inlined_call_operand.vmem [shape: f32[8,128], index: 7, kind: output, shape index: {}]  }
   0x1   :  { %421 = vmatprep.subr.bf16.mxu0 %v475_v0  ;;  %v27_v1 = vld [vmem:[%s655_s1] sm:$0xff]  ;;  %v28_v2 = vld [vmem:[%s655_s1 + $0x8] sm:$0xff]  ;;  %348 = vmatprep.mubr.msk.f32.mxu0 %vm476_vm0, %v477_v3  ;;  %v113_v7 = vld [vmem:[%s656_s3 + $0x10] sm:$0xff] }
   0x2   :  { %v422_v4 = vpack.c.bf16 %v28_v2, %v27_v1  ;;  %424 = vmatprep.subr.bf16.mxu1 %v475_v0  ;;  %v111_v5 = vld [vmem:[%s656_s3] sm:$0xff]  ;;  %v112_v6 = vld [vmem:[%s656_s3 + $0x8] sm:$0xff]  ;;  %383 = vmatprep.mubr.msk.f32.mxu1 %vm476_vm0, %v477_v3  ;;  %v114_v9 = vld [vmem:[%s656_s3 + $0x18] sm:$0xff] }
   0x3   :  { %v425_v8 = vpack.c.bf16 %v112_v6, %v111_v5  ;;  %v26_v10 = vld [vmem:[%s657_s0] sm:$0xff]  ;;  %v428_v11 = vpack.c.bf16 %v114_v9, %v113_v7  ;;  %v116_v13 = vld [vmem:[%s656_s3 + $0x28] sm:$0xff]  ;;  %v117_v15 = vld [vmem:[%s656_s3 + $0x30] sm:$0xff] }
   0x4   :  { %423 = vmatpush3.bf16.msra.mxu0 %v422_v4  ;;  %v115_v12 = vld [vmem:[%s656_s3 + $0x20] sm:$0xff]  ;;  %v118_v16 = vld [vmem:[%s656_s3 + $0x38] sm:$0xff]  ;;  %v120_v19 = vld [vmem:[%s656_s3 + $0x48] sm:$0xff] }
   0x5   :  { %426 = vmatpush3.bf16.msra.mxu1 %v425_v8  ;;  %448 = vmatprep.subr.bf16.mxu0 %v475_v0  ;;  %v431_v14 = vpack.c.bf16 %v116_v13, %v115_v12  ;;  %v434_v17 = vpack.c.bf16 %v118_v16, %v117_v15  ;;  %v119_v18 = vld [vmem:[%s656_s3 + $0x40] sm:$0xff]  ;;  %v121_v21 = vld [vmem:[%s656_s3 + $0x50] sm:$0xff]  ;;  %v122_v22 = vld [vmem:[%s656_s3 + $0x58] sm:$0xff] }
   0x6   :  { %427 = vmatprep.subr.bf16.mxu1 %v475_v0  ;;  %v437_v20 = vpack.c.bf16 %v120_v19, %v119_v18  ;;  %v440_v23 = vpack.c.bf16 %v122_v22, %v121_v21  ;;  %v123_v24 = vld [vmem:[%s656_s3 + $0x60] sm:$0xff]  ;;  %v124_v25 = vld [vmem:[%s656_s3 + $0x68] sm:$0xff]  ;;  %v125_v27 = vld [vmem:[%s656_s3 + $0x70] sm:$0xff] }
   0x7   :  { %349 = vmatmul.mubr.msk.f32.vlgmr.msra.gmra.mrb[0].mxu0 %vm36_vm1, %v26_v10  ;;  %v443_v26 = vpack.c.bf16 %v124_v25, %v123_v24  ;;  %v126_v28 = vld [vmem:[%s656_s3 + $0x78] sm:$0xff]  ;;  %v205_v30 = vld [vmem:[%s658_s5] sm:$0xff]  ;;  %v206_v31 = vld [vmem:[%s658_s5 + $0x8] sm:$0xff] }
   0x8   :  { %418 = vmatprep.mubr.msk.f32.mxu0 %vm476_vm0, %v477_v3  ;;  %v446_v29 = vpack.c.bf16 %v126_v28, %v125_v27  ;;  %v207_v32 = vld [vmem:[%s658_s5 + $0x10] sm:$0xff]  ;;  %v449_v33 = vpack.c.bf16 %v206_v31, %v205_v30  ;;  %v208_v34 = vld [vmem:[%s658_s5 + $0x18] sm:$0xff]  ;;  %v209_v36 = vld [vmem:[%s658_s5 + $0x20] sm:$0xff] }
   0x9   :  { %429 = vmatpush3.bf16.msra.mxu1 %v428_v11  ;;  %v452_v35 = vpack.c.bf16 %v208_v34, %v207_v32  ;;  %v210_v37 = vld [vmem:[%s658_s5 + $0x28] sm:$0xff]  ;;  %v211_v39 = vld [vmem:[%s658_s5 + $0x30] sm:$0xff]  ;;  %v212_v40 = vld [vmem:[%s658_s5 + $0x38] sm:$0xff] }
   0xa   :  { %430 = vmatprep.subr.bf16.mxu1 %v475_v0  ;;  %450 = vmatpush3.bf16.msra.mxu0 %v449_v33  ;;  %v455_v38 = vpack.c.bf16 %v210_v37, %v209_v36  ;;  %v458_v41 = vpack.c.bf16 %v212_v40, %v211_v39  ;;  %v213_v42 = vld [vmem:[%s658_s5 + $0x40] sm:$0xff]  ;;  %v214_v43 = vld [vmem:[%s658_s5 + $0x48] sm:$0xff]  ;;  %v215_v45 = vld [vmem:[%s658_s5 + $0x50] sm:$0xff] }
   0xb   :  { %451 = vmatprep.subr.bf16.mxu0 %v475_v0  ;;  %v461_v44 = vpack.c.bf16 %v214_v43, %v213_v42  ;;  %v216_v46 = vld [vmem:[%s658_s5 + $0x58] sm:$0xff]  ;;  %v217_v48 = vld [vmem:[%s658_s5 + $0x60] sm:$0xff]  ;;  %v218_v49 = vld [vmem:[%s658_s5 + $0x68] sm:$0xff] }
   0xc   :  { %v464_v47 = vpack.c.bf16 %v216_v46, %v215_v45  ;;  %v467_v50 = vpack.c.bf16 %v218_v49, %v217_v48  ;;  %v303_v51 = vld [vmem:[%s659_s2] ss:$0 sm:$0xff]  ;;  %v219_v56 = vld [vmem:[%s658_s5 + $0x70] sm:$0xff]  ;;  %v220_v57 = vld [vmem:[%s658_s5 + $0x78] sm:$0xff] }
   0xd   :  { %432 = vmatpush3.bf16.msra.mxu1 %v431_v14  ;;  %v470_v58 = vpack.c.bf16 %v220_v57, %v219_v56  ;;  %v305_v59 = vld [vmem:[%s660_s4] ss:$0 sm:$0xff] }
   0xe   :  { %433 = vmatprep.subr.bf16.mxu1 %v475_v0  ;;  %453 = vmatpush3.bf16.msra.mxu0 %v452_v35 }
   0xf   :  { %454 = vmatprep.subr.bf16.mxu0 %v475_v0 }
  0x11   :  { %435 = vmatpush3.bf16.msra.mxu1 %v434_v17 }
  0x12   :  { %436 = vmatprep.subr.bf16.mxu1 %v475_v0  ;;  %456 = vmatpush3.bf16.msra.mxu0 %v455_v38 }
  0x13   :  { %457 = vmatprep.subr.bf16.mxu0 %v475_v0 }
  0x15   :  { %438 = vmatpush3.bf16.msra.mxu1 %v437_v20 }
  0x16   :  { %439 = vmatprep.subr.bf16.mxu1 %v475_v0  ;;  %459 = vmatpush3.bf16.msra.mxu0 %v458_v41 }
  0x17   :  { %460 = vmatprep.subr.bf16.mxu0 %v475_v0 }
  0x19   :  { %441 = vmatpush3.bf16.msra.mxu1 %v440_v23 }
  0x1a   :  { %442 = vmatprep.subr.bf16.mxu1 %v475_v0  ;;  %462 = vmatpush3.bf16.msra.mxu0 %v461_v44 }
  0x1b   :  { %463 = vmatprep.subr.bf16.mxu0 %v475_v0 }
  0x1d   :  { %444 = vmatpush3.bf16.msra.mxu1 %v443_v26 }
  0x1e   :  { %445 = vmatprep.subr.bf16.mxu1 %v475_v0  ;;  %465 = vmatpush3.bf16.msra.mxu0 %v464_v47 }
  0x1f   :  { %466 = vmatprep.subr.bf16.mxu0 %v475_v0 }
  0x21   :  { %447 = vmatpush3.bf16.msra.mxu1 %v446_v29 }
  0x22   :  { %468 = vmatpush3.bf16.msra.mxu0 %v467_v50 }
  0x23   :  { %469 = vmatprep.subr.bf16.mxu0 %v475_v0  ;;  %v306_v0 = vld [vmem:[%s661_s6] ss:$0 sm:$0xff] }
  0x26   :  { %471 = vmatpush3.bf16.msra.mxu0 %v470_v58 }
  0xda   :  { %v106_v52 = vpop.f32.mrb[0].mxu0 }
  0xdb   :  { %v107_v53 = vadd.f32 %v303_v51, %v106_v52  ;;  %v350_v54 = vpop.f32.mrb[1].mxu0 }
  0xdd   :  { %v110_v55 = vmax.f32 %v107_v53, 0.0 }
  0xdf   :  { %384 = vmatmul.mubr.f32.vlgmr.msra.gmra.mrb[0].mxu1 %v110_v55 }
 0x1b2   :  { %v200_v60 = vpop.f32.mrb[0].mxu1 }
 0x1b3   :  { %v201_v61 = vadd.f32 %v305_v59, %v200_v60  ;;  %v385_v62 = vpop.f32.mrb[1].mxu1 }
 0x1b5   :  { %v204_v63 = vmax.f32 %v201_v61, 0.0 }
 0x1b7   :  { %419 = vmatmul.mubr.f32.vlgmr.msra.gmra.mrb[2].mxu0 %v204_v63 }
 0x28a   :  { %v294_v1 = vpop.f32.mrb[2].mxu0 }
 0x28b   :  { %v295_v2 = vadd.f32 %v306_v0, %v294_v1  ;;  %v420_v3 = vpop.f32.mrb[3].mxu0 }
 0x28d   :  { %298 = vst [vmem:[%s662_s7] sm:$0xff] %v295_v2 }

</bundles_post_ra>
